<compile_context>
chip_gen: v5e
topology: v5e:2x2
jax: 0.10.0
libtpu: 0.0.40
codegen_flags: <defaults>
</compile_context>

<pallas_src>
import functools

import jax
import jax.numpy as jnp
from jax import lax
from jax.experimental import pallas as pl
from jax.experimental.pallas import tpu as pltpu


def _round_up(x, m):
    return ((x + m - 1) // m) * m


def _focal_kernel(n_valid_ref, logits_ref, targets_ref, out_ref, *, gamma):
    # n_valid_ref: SMEM (1,) int32 (scalar prefetch)
    # logits_ref:  (BLOCK_N, C) f32/bf16      targets_ref: (BLOCK_N, 1) int32
    # out_ref:     (1, 8, 128) f32 lane-dense per-tile partial sum
    i = pl.program_id(0)
    n_valid = n_valid_ref[0]

    x = logits_ref[...].astype(jnp.float32)            # (BN, C)
    tgt = targets_ref[...]                              # (BN, 1)
    bn, c = x.shape

    col_ids = lax.broadcasted_iota(jnp.int32, (bn, c), 1)
    onehot = col_ids == tgt                              # (BN, C)

    # picked on the raw logits (independent of the row max) so the select-sum
    # can be scheduled in the same sweep as the max; ce = logsumexp(x) - x[t].
    picked = jnp.sum(jnp.where(onehot, x, 0.0), axis=-1, keepdims=True)  # (BN,1)
    m = jnp.max(x, axis=-1, keepdims=True)                               # (BN,1)
    sumexp = jnp.sum(jnp.exp(x - m), axis=-1, keepdims=True)             # (BN,1)
    ce = (jnp.log(sumexp) + m) - picked                                  # (BN,1)

    # focal modulation: (1-pt)^gamma * ce, pt = exp(-ce); clamp so fp rounding
    # pushing pt marginally above 1 cannot produce a negative base.
    pt = jnp.exp(-ce)
    one_minus_pt = jnp.maximum(1.0 - pt, 0.0)
    if isinstance(gamma, int):
        mod = one_minus_pt ** gamma            # lax.integer_pow -> VPU multiplies
    else:
        mod = one_minus_pt ** jnp.float32(gamma)
    focal = mod * ce                                                      # (BN,1)

    # Tail-tile rows past n_valid hold garbage (no host-side padding), possibly
    # NaN/inf; this MUST remain a jnp.where select, never a multiply-by-mask.
    row_ids = i * bn + lax.broadcasted_iota(jnp.int32, (bn, 1), 0)
    focal = jnp.where(row_ids < n_valid, focal, 0.0)

    out_ref[...] = jnp.full(out_ref.shape, jnp.sum(focal), jnp.float32)


def _pick_block_n(n, c, itemsize, working_set_budget=24 << 20, min_tiles=8):
    """Size BLOCK_N from the f32 working set, not just input-tile bytes."""
    c_pad = _round_up(c, 128)  # VMEM lane padding for small C
    # per row: double-buffered input tile + ~5 full-tile f32/int32 temporaries
    # (cast x, iota, onehot-select, exp(x-m), where) + lane-padded (BN,1)
    # int32 targets buffer (x2 double buffering).
    per_row = c_pad * (2 * itemsize + 20) + 2 * 128 * 4
    fit = max(8, (working_set_budget // per_row) // 8 * 8)
    # Keep at least ~min_tiles grid steps so the "parallel" axis has work to
    # shard across v7x's 2 TensorCores and the DMA pipeline has steps to overlap.
    cap = max(8, _round_up(pl.cdiv(n, min_tiles), 8))
    return max(8, min(fit, cap))


def focal_loss(logits, targets, gamma=2, reduction="mean", block_n=None):
    """logits: (N, C) f32/bf16; targets: (N,) int class indices."""
    if reduction not in ("mean", "sum"):
        raise NotImplementedError("only reduction='mean'|'sum' supported")
    n, c = logits.shape
    targets_in = targets.astype(jnp.int32).reshape(n, 1)   # free reshape, no copy
    itemsize = jnp.dtype(logits.dtype).itemsize

    if block_n is None:
        block_n = _pick_block_n(n, c, itemsize)
    else:
        block_n = max(8, _round_up(block_n, 8))

    num_tiles = pl.cdiv(n, block_n)
    n_valid = jnp.array([n], dtype=jnp.int32)

    grid_spec = pltpu.PrefetchScalarGridSpec(
        num_scalar_prefetch=1,
        grid=(num_tiles,),
        in_specs=[
            pl.BlockSpec((block_n, c), lambda i, n_ref: (i, 0)),
            pl.BlockSpec((block_n, 1), lambda i, n_ref: (i, 0)),
        ],
        out_specs=pl.BlockSpec((1, 8, 128), lambda i, n_ref: (i, 0, 0)),
    )

    cost = pl.CostEstimate(
        flops=int(8 * n * c),
        transcendentals=int(n * c + 3 * n),
        bytes_accessed=int(n * c * itemsize + n * 4 + num_tiles * 8 * 128 * 4),
    )

    partials = pl.pallas_call(
        functools.partial(_focal_kernel, gamma=gamma),
        out_shape=jax.ShapeDtypeStruct((num_tiles, 8, 128), jnp.float32),
        grid_spec=grid_spec,
        compiler_params=pltpu.CompilerParams(
            dimension_semantics=("parallel",),   # megacore-shardable on v7x
            vmem_limit_bytes=48 * 1024 * 1024,
        ),
        cost_estimate=cost,
    )(n_valid, logits, targets_in)

    total = jnp.sum(partials[:, 0, 0])
    if reduction == "mean":
        return total / jnp.float32(n)
    return total


def _reference(logits, targets, gamma=2, reduction="mean"):
    logp = jax.nn.log_softmax(logits.astype(jnp.float32), axis=-1)
    ce = -jnp.take_along_axis(logp, targets[:, None].astype(jnp.int32), axis=-1)[:, 0]
    pt = jnp.exp(-ce)
    fl = (1.0 - pt) ** gamma * ce
    return jnp.mean(fl) if reduction == "mean" else jnp.sum(fl)


if __name__ == "__main__":
    key = jax.random.PRNGKey(0)
    k1, k2, k3, k4 = jax.random.split(key, 4)

    # Case 1: small class count (C=32) -> row layout rides VMEM lane padding,
    # single tile, no host-side transpose or pad.
    n1, c1 = 8, 32
    logits1 = jax.random.normal(k1, (n1, c1), dtype=jnp.float32)
    targets1 = jax.random.randint(k2, (n1,), 0, c1, dtype=jnp.int32)
    out1 = jax.block_until_ready(focal_loss(logits1, targets1, gamma=2))
    ref1 = _reference(logits1, targets1, gamma=2)
    assert jnp.allclose(out1, ref1, atol=1e-5, rtol=1e-5), (out1, ref1)

    # Case 2: C=128, forced small block_n -> multi-tile grid with an UNPADDED
    # partial tail tile (exercises the in-kernel n_valid mask on garbage rows).
    n2, c2 = 20, 128
    logits2 = jax.random.normal(k3, (n2, c2), dtype=jnp.float32)
    targets2 = jax.random.randint(k4, (n2,), 0, c2, dtype=jnp.int32)
    out2 = jax.block_until_ready(focal_loss(logits2, targets2, gamma=2, block_n=8))
    ref2 = _reference(logits2, targets2, gamma=2)
    assert jnp.allclose(out2, ref2, atol=1e-5, rtol=1e-5), (out2, ref2)

    # Case 3: bf16 logits streamed as-is (f32 math in-kernel), reduction='sum'.
    logits3 = logits2.astype(jnp.bfloat16)
    out3 = jax.block_until_ready(focal_loss(logits3, targets2, gamma=2, reduction="sum"))
    ref3 = _reference(logits3.astype(jnp.float32), targets2, gamma=2, reduction="sum")
    assert jnp.allclose(out3, ref3, atol=1e-3, rtol=1e-3), (out3, ref3)

    # Case 4: auto block_n with the >=8-tile megacore floor and a ragged tail.
    k5, k6 = jax.random.split(k1)
    n4, c4 = 300, 40
    logits4 = jax.random.normal(k5, (n4, c4), dtype=jnp.float32)
    targets4 = jax.random.randint(k6, (n4,), 0, c4, dtype=jnp.int32)
    out4 = jax.block_until_ready(focal_loss(logits4, targets4, gamma=2))
    ref4 = _reference(logits4, targets4, gamma=2)
    assert jnp.allclose(out4, ref4, atol=1e-5, rtol=1e-5), (out4, ref4)

    print("KERNEL_OK")
</pallas_src>

<mosaic_0001>
module attributes {stable_mosaic.version = 11 : i64} {
  func.func @_focal_kernel(%arg0: i32, %arg1: memref<1xi32, #tpu.memory_space<smem>>, %arg2: memref<8x32xf32, #tpu.memory_space<vmem>>, %arg3: memref<8x1xi32, #tpu.memory_space<vmem>>, %arg4: memref<1x8x128xf32, #tpu.memory_space<vmem>>) attributes {dimension_semantics = [#tpu.dimension_semantics<parallel>], iteration_bounds = array<i64: 1>, scalar_prefetch = 1 : i64, scratch_operands = 0 : i64, tpu.core_type = #tpu.core_type<tc>, window_params = [{transform_indices = @transform_0, window_bounds = array<i64: 8, 32>}, {transform_indices = @transform_1, window_bounds = array<i64: 8, 1>}, {transform_indices = @transform_2, window_bounds = array<i64: 1, 8, 128>}]} {
    %c0 = arith.constant 0 : index
    %0 = memref.load %arg1[%c0] : memref<1xi32, #tpu.memory_space<smem>>
    %c0_0 = arith.constant 0 : index
    %c0_1 = arith.constant 0 : index
    %1 = vector.load %arg2[%c0_0, %c0_1] : memref<8x32xf32, #tpu.memory_space<vmem>>, vector<8x32xf32>
    %c0_2 = arith.constant 0 : index
    %c0_3 = arith.constant 0 : index
    %2 = vector.load %arg3[%c0_2, %c0_3] : memref<8x1xi32, #tpu.memory_space<vmem>>, vector<8x1xi32>
    %3 = tpu.iota {dimensions = array<i32: 1>} : vector<8x32xi32>
    %4 = vector.broadcast %2 : vector<8x1xi32> to vector<8x32xi32>
    %5 = arith.cmpi eq, %3, %4 : vector<8x32xi32>
    %cst = arith.constant 0.000000e+00 : f32
    %6 = vector.broadcast %cst : f32 to vector<8x32xf32>
    %7 = arith.select %5, %1, %6 : vector<8x32xi1>, vector<8x32xf32>
    %cst_4 = arith.constant dense<0.000000e+00> : vector<8xf32>
    %8 = vector.multi_reduction <add>, %7, %cst_4 [1] : vector<8x32xf32> to vector<8xf32>
    %9 = vector.shape_cast %8 : vector<8xf32> to vector<8x1xf32>
    %cst_5 = arith.constant dense<0xFF800000> : vector<8xf32>
    %10 = vector.multi_reduction <maximumf>, %1, %cst_5 [1] : vector<8x32xf32> to vector<8xf32>
    %11 = vector.shape_cast %10 : vector<8xf32> to vector<8x1xf32>
    %12 = vector.broadcast %11 : vector<8x1xf32> to vector<8x32xf32>
    %13 = arith.subf %1, %12 : vector<8x32xf32>
    %14 = math.exp %13 : vector<8x32xf32>
    %cst_6 = arith.constant dense<0.000000e+00> : vector<8xf32>
    %15 = vector.multi_reduction <add>, %14, %cst_6 [1] : vector<8x32xf32> to vector<8xf32>
    %16 = vector.shape_cast %15 : vector<8xf32> to vector<8x1xf32>
    %17 = math.log %16 : vector<8x1xf32>
    %18 = arith.addf %17, %11 : vector<8x1xf32>
    %19 = arith.subf %18, %9 : vector<8x1xf32>
    %cst_7 = arith.constant 0.000000e+00 : f32
    %20 = vector.broadcast %cst_7 : f32 to vector<8x1xf32>
    %21 = arith.subf %20, %19 : vector<8x1xf32>
    %22 = math.exp %21 : vector<8x1xf32>
    %cst_8 = arith.constant 1.000000e+00 : f32
    %23 = vector.broadcast %cst_8 : f32 to vector<8x1xf32>
    %24 = arith.subf %23, %22 : vector<8x1xf32>
    %cst_9 = arith.constant 0.000000e+00 : f32
    %25 = vector.broadcast %cst_9 : f32 to vector<8x1xf32>
    %26 = arith.maximumf %24, %25 : vector<8x1xf32>
    %27 = arith.mulf %26, %26 : vector<8x1xf32>
    %28 = arith.mulf %27, %19 : vector<8x1xf32>
    %c8_i32 = arith.constant 8 : i32
    %29 = arith.muli %arg0, %c8_i32 : i32
    %30 = tpu.iota {dimensions = array<i32: 0>} : vector<8x1xi32>
    %31 = vector.broadcast %29 : i32 to vector<8x1xi32>
    %32 = arith.addi %31, %30 : vector<8x1xi32>
    %33 = vector.broadcast %0 : i32 to vector<8x1xi32>
    %34 = arith.cmpi slt, %32, %33 : vector<8x1xi32>
    %cst_10 = arith.constant 0.000000e+00 : f32
    %35 = vector.broadcast %cst_10 : f32 to vector<8x1xf32>
    %36 = arith.select %34, %28, %35 : vector<8x1xi1>, vector<8x1xf32>
    %37 = vector.shape_cast %36 : vector<8x1xf32> to vector<1x8x1xf32>
    %cst_11 = arith.constant dense<0.000000e+00> : vector<1xf32>
    %38 = vector.multi_reduction <add>, %37, %cst_11 [1, 2] : vector<1x8x1xf32> to vector<1xf32>
    %39 = vector.shape_cast %38 : vector<1xf32> to vector<1x1x1xf32>
    %40 = vector.extract %39[0, 0, 0] : f32 from vector<1x1x1xf32>
    %41 = vector.broadcast %40 : f32 to vector<1x8x128xf32>
    %c0_12 = arith.constant 0 : index
    %c0_13 = arith.constant 0 : index
    %c0_14 = arith.constant 0 : index
    %42 = vector.load %arg4[%c0_12, %c0_13, %c0_14] : memref<1x8x128xf32, #tpu.memory_space<vmem>>, vector<1x8x128xf32>
    tpu.vector_store %arg4[%c0_12, %c0_13, %c0_14], %41 {strides = array<i32>} : memref<1x8x128xf32, #tpu.memory_space<vmem>>, vector<1x8x128xf32>,
    return
  }
  func.func @transform_0(%arg0: i32, %arg1: memref<1xi32, #tpu.memory_space<smem>>) -> (i32, i32) {
    %c0_i32 = arith.constant 0 : i32
    %c0_i32_0 = arith.constant 0 : i32
    return %arg0, %c0_i32 : i32, i32
  }
  func.func @transform_1(%arg0: i32, %arg1: memref<1xi32, #tpu.memory_space<smem>>) -> (i32, i32) {
    %c0_i32 = arith.constant 0 : i32
    %c0_i32_0 = arith.constant 0 : i32
    return %arg0, %c0_i32 : i32, i32
  }
  func.func @transform_2(%arg0: i32, %arg1: memref<1xi32, #tpu.memory_space<smem>>) -> (i32, i32, i32) {
    %c0_i32 = arith.constant 0 : i32
    %c0_i32_0 = arith.constant 0 : i32
    %c0_i32_1 = arith.constant 0 : i32
    return %arg0, %c0_i32, %c0_i32_0 : i32, i32, i32
  }
}

</mosaic_0001>

<bundles_post_ra>
// kernel: tpu_custom_call.1
= control target key start
LH: loop header
LB: loop body
LE: loop exit
PB: predicated region body
PF: predicated region fallthrough
CT: control target
= control target key end

     0   :  { %vm24_vm0 = vcmask 261120   ;;  %s159_s0 = inlined_call_operand.<no memory space> [shape: s32[1], index: 0, kind: input, shape index: {}]   ;;  %s160_s1 = inlined_call_operand.vmem [shape: f32[8,32], index: 1, kind: input, shape index: {}]   ;;  %s161_s2 = inlined_call_operand.vmem [shape: s32[8,1], index: 2, kind: input, shape index: {}]   ;;  %s162_s3 = inlined_call_operand.hbm [shape: f32[1,8,128], index: 3, kind: output, shape index: {}]  }
   0x1   :  { %v15_v0 = vld [vmem:[%s160_s1] sm:$0xff] }
   0x2   :  { %9 = vsyncpa [#allocation5], 0  ;;  %v28_v1 = vsel %vm24_vm0, %v15_v0, -inf  ;;  %v122_v2 = vmov 0   ;;  %v16_v3 = vld [vmem:[%s161_s2] sm:$0xff]  ;;  %v17_v9 = vlaneseq  ;;  %v53_v26 = vstv %s159_s0  ;;  %s123_s16 = smov [#allocation4]  }
   0x3   :  { %89 = vset.pattern.permute.xlu0 %v122_v2  ;;  %vm56_vm3 = vcmask 7168   ;;  %s74_s17 = sshll.u32 %s123_s16, 4  ;;  %s76_s0 = sshll.u32 %s162_s3, 4  ;;  %s75_s17 = int_to_ptr.vmem [resolvable:$true] %s74_s17  ;;  %s77_s0 = int_to_ptr.hbm [resolvable:$true] %s76_s0 }
   0x4   :  { %29 = vmax.xlane.f32.xlu0 %v28_v1  ;;  %v18_v10 = vand.u32 127, %v17_v9  ;;  %v50_v24 = vshrl.u32 %v17_v9, 7 }
   0x6   :  { %vm54_vm2 = vcmp.lt.s32.totalorder %v50_v24, %v53_v26 }
  0x18   :  { %20 = vperm.xlu0 %89, %v16_v3  }
  0x77   :  { %v30_v4 = vpop.xlane.xlu0 %29 }
  0x78   :  { %v31_v5 = vsub.f32 %v15_v0, %v30_v4 }
  0x7a   :  { %v32_v6 = vmul.f32 1.442695, %v31_v5 }
  0x7c   :  { %90 = vpow2.f32 %v32_v6 }
  0x82   :  { %v91_v7 = vpop.eup %90 }
  0x83   :  { %v34_v8 = vsel %vm24_vm0, %v91_v7, 0.0 }
  0x84   :  { %35 = vadd.xlane.f32.xlu1 %v34_v8 }
  0x8a   :  { %v21_v11 = vpop.permute.xlu0 %20 }
  0x8b   :  { %vm22_vm1 = vcmp.eq.s32.totalorder %v18_v10, %v21_v11 }
  0x8c   :  { %v23_v12 = vsel %vm22_vm1, %v15_v0, 0.0 }
  0x8d   :  { %v25_v13 = vsel %vm24_vm0, %v23_v12, 0.0 }
  0x8e   :  { %26 = vadd.xlane.f32.xlu1 %v25_v13 }
  0xf7   :  { %v36_v14 = vpop.xlane.xlu1 %35 }
  0xf8   :  { %92 = vlog2.f32 %v36_v14 }
  0xfe   :  { %v93_v15 = vpop.eup %92 }
  0xff   :  { %v38_v16 = vmul.f32 0.6931472, %v93_v15 }
 0x101   :  { %v39_v17 = vadd.f32 %v38_v16, %v30_v4  ;;  %v27_v18 = vpop.xlane.xlu1 %26 }
 0x103   :  { %v40_v19 = vsub.f32 %v39_v17, %v27_v18 }
 0x105   :  { %v41_v20 = vsub.f32 0.0, %v40_v19 }
 0x107   :  { %v42_v21 = vmul.f32 1.442695, %v41_v20 }
 0x109   :  { %94 = vpow2.f32 %v42_v21 }
 0x10f   :  { %v95_v22 = vpop.eup %94 }
 0x110   :  { %v44_v23 = vsub.f32 1.0, %v95_v22 }
 0x112   :  { %v45_v25 = vmax.f32 %v44_v23, 0.0 }
 0x114   :  { %v46_v27 = vmul.f32 %v45_v25, %v45_v25 }
 0x116   :  { %v47_v28 = vmul.f32 %v46_v27, %v40_v19 }
 0x118   :  { %v55_v29 = vsel %vm54_vm2, %v47_v28, 0.0 }
 0x119   :  { %v57_v30 = vsel %vm56_vm3, %v55_v29, 0.0 }
 0x11a   :  { %58 = vadd.xlane.f32.xlu2 %v57_v30 }
 0x18d   :  { %v59_v31 = vpop.xlane.xlu2 %58 }
 0x18e   :  { %v60_v32 = vrot.slane %v59_v31, 4 }
 0x190   :  { %v61_v33 = vadd.f32 %v60_v32, %v59_v31 }
 0x192   :  { %v62_v34 = vrot.slane %v61_v33, 2 }
 0x194   :  { %v63_v35 = vadd.f32 %v62_v34, %v61_v33 }
 0x196   :  { %v64_v36 = vrot.slane %v63_v35, 1 }
 0x198   :  { %v65_v37 = vadd.f32 %v64_v36, %v63_v35 }
 0x19a   :  { %85 = vpush %v65_v37 }
 0x1cb   :  { %s86_s20 = spop %85 }
 0x1cc   :  { %v67_v38 = vstv %s86_s20 }
 0x1cd   :  { %68 = vst [vmem:[#allocation4] sm:$0xff] %v67_v38 }
 0x1ce   :  { %79 = dma.vmem_to_hbm [thread:$0]  %s75_s17, 128, %s77_s0, [#allocation5]  }
 0x1cf   :  { %120 = dma.done.wait [#allocation5], 128  }
 0x1d0   :  { %121 = vsyncadd [#allocation5], 4294967168 }
 0x1d1   :  { %84 = vsyncpa [#allocation5], 1 }

</bundles_post_ra>
